<compile_context>
chip_gen: v7x
topology: tpu7x:2x2x1
jax: 0.10.0
libtpu: 0.0.40
codegen_flags: <defaults>
</compile_context>

<pallas_src>
import functools

import jax
import jax.numpy as jnp
from jax import lax
from jax.experimental import pallas as pl
from jax.experimental.pallas import tpu as pltpu

LANES = 128
SUBLANES = 8


def _round_down(x, m):
    return (x // m) * m


def _tumorseg_sums_kernel(pred_ref, targ_ref, seg_ref, out_ref, *,
                          n_rows, tile_rows, chunk_rows, unroll):
    """Accumulates sum(|p-t|) and sum(|p-t|*|s|) into a resident (2,8,128) output."""
    i = pl.program_id(0)
    n_chunks = tile_rows // chunk_rows
    base_row = i * tile_rows

    @pl.when(i == 0)
    def _():
        out_ref[...] = jnp.zeros_like(out_ref)

    def accumulate(masked):
        def body(j, carry):
            acc_l1, acc_tum = carry
            r = pl.multiple_of(j * chunk_rows, chunk_rows)
            p = pred_ref[pl.ds(r, chunk_rows), :].astype(jnp.float32)
            t = targ_ref[pl.ds(r, chunk_rows), :].astype(jnp.float32)
            s = seg_ref[pl.ds(r, chunk_rows), :].astype(jnp.float32)
            ad = jnp.abs(p - t)          # |p - t|
            tum = ad * jnp.abs(s)        # |p*s - t*s| == |p-t| * |s|
            if masked:
                # Only the ragged boundary tile pays for the iota/compare/select.
                row_ids = base_row + r + lax.broadcasted_iota(
                    jnp.int32, (chunk_rows, LANES), 0)
                valid = row_ids < n_rows
                ad = jnp.where(valid, ad, 0.0)
                tum = jnp.where(valid, tum, 0.0)
            # Fold the chunk's sublane groups into (8,128) with pure VPU adds.
            acc_l1 = acc_l1 + jnp.sum(
                ad.reshape(chunk_rows // SUBLANES, SUBLANES, LANES), axis=0)
            acc_tum = acc_tum + jnp.sum(
                tum.reshape(chunk_rows // SUBLANES, SUBLANES, LANES), axis=0)
            return acc_l1, acc_tum

        zeros = jnp.zeros((SUBLANES, LANES), jnp.float32)
        acc_l1, acc_tum = lax.fori_loop(0, n_chunks, body, (zeros, zeros),
                                        unroll=unroll)
        out_ref[0] += acc_l1
        out_ref[1] += acc_tum

    if n_rows % tile_rows == 0:
        # Static: every block is full -> no mask path is ever compiled.
        accumulate(masked=False)
    else:
        is_boundary = base_row + tile_rows > n_rows

        @pl.when(jnp.logical_not(is_boundary))
        def _():
            accumulate(masked=False)     # interior tiles: unmasked fast path

        @pl.when(is_boundary)
        def _():
            accumulate(masked=True)      # the single ragged boundary tile


def tumorseg_loss(predictions, target, seg, *, alpha, tile_rows=2048):
    """loss = mean|p-t| + alpha * mean|p*s - t*s|  (Tumorseg_Loss.forward)."""
    total = predictions.size
    flat_p = predictions.reshape(-1)
    flat_t = target.reshape(-1)
    flat_s = seg.reshape(-1)

    n_rows = total // LANES              # lane-dense rows handled by the kernel
    n_main = n_rows * LANES
    rem = total - n_main                 # < 128 leftover elements

    tail_l1 = jnp.float32(0.0)
    tail_tum = jnp.float32(0.0)
    if rem or n_rows < SUBLANES:
        # Tiny tail (< 128 elements) and/or tiny inputs handled with plain jnp.
        start = n_main if n_rows >= SUBLANES else 0
        tp = flat_p[start:].astype(jnp.float32)
        tt = flat_t[start:].astype(jnp.float32)
        ts = flat_s[start:].astype(jnp.float32)
        ad = jnp.abs(tp - tt)
        tail_l1 = jnp.sum(ad)
        tail_tum = jnp.sum(ad * jnp.abs(ts))

    if n_rows < SUBLANES:
        sum_l1, sum_tum = tail_l1, tail_tum
    else:
        if rem:
            # TODO(synk): total % 128 != 0 forces a prefix copy (slices do not
            # fuse into pallas_call); unavoidable without padding, rare for
            # image-shaped inputs.
            p2d = flat_p[:n_main].reshape(n_rows, LANES)
            t2d = flat_t[:n_main].reshape(n_rows, LANES)
            s2d = flat_s[:n_main].reshape(n_rows, LANES)
        else:
            p2d = flat_p.reshape(n_rows, LANES)   # free: contiguous reshape
            t2d = flat_t.reshape(n_rows, LANES)
            s2d = flat_s.reshape(n_rows, LANES)

        tile_rows_eff = min(tile_rows, _round_down(n_rows, SUBLANES))
        chunk_rows = 64 if tile_rows_eff % 64 == 0 else SUBLANES
        n_chunks = tile_rows_eff // chunk_rows
        unroll = min(4, n_chunks)
        num_tiles = pl.cdiv(n_rows, tile_rows_eff)

        itemsize = jnp.dtype(p2d.dtype).itemsize
        block_bytes = tile_rows_eff * LANES * itemsize
        # 3 inputs x double buffering + slack; keep within every chip's VMEM.
        vmem_limit = max(3 * 2 * block_bytes + (2 << 20), 16 * 1024 * 1024)

        kernel = functools.partial(
            _tumorseg_sums_kernel, n_rows=n_rows, tile_rows=tile_rows_eff,
            chunk_rows=chunk_rows, unroll=unroll)

        in_spec = pl.BlockSpec((tile_rows_eff, LANES), lambda i: (i, 0))
        partials = pl.pallas_call(
            kernel,
            out_shape=jax.ShapeDtypeStruct((2, SUBLANES, LANES), jnp.float32),
            grid=(num_tiles,),
            in_specs=[in_spec, in_spec, in_spec],
            out_specs=pl.BlockSpec((2, SUBLANES, LANES), lambda i: (0, 0, 0)),
            compiler_params=pltpu.CompilerParams(
                dimension_semantics=("arbitrary",),
                vmem_limit_bytes=int(vmem_limit)),
        )(p2d, t2d, s2d)

        sum_l1 = jnp.sum(partials[0]) + tail_l1
        sum_tum = jnp.sum(partials[1]) + tail_tum

    inv_count = 1.0 / float(total)
    loss_l1 = sum_l1 * inv_count
    loss_tumor = alpha * (sum_tum * inv_count)
    return loss_l1 + loss_tumor


def _reference(predictions, target, seg, alpha):
    loss_l1 = jnp.mean(jnp.abs(predictions - target))
    loss_tumor = alpha * jnp.mean(jnp.abs(predictions * seg - target * seg))
    return loss_l1 + loss_tumor


if __name__ == "__main__":
    alpha = 2.0

    key = jax.random.PRNGKey(0)
    k1, k2, k3 = jax.random.split(key, 3)
    # NCHW inputs, as in the PyTorch training script.
    B, C, H, W = 2, 4, 16, 16
    predictions = jax.random.uniform(k1, (B, C, H, W), dtype=jnp.float32)
    target = jax.random.uniform(k2, (B, C, H, W), dtype=jnp.float32)
    seg = (jax.random.uniform(k3, (B, C, H, W)) > 0.5).astype(jnp.float32)

    loss_fn = jax.jit(functools.partial(tumorseg_loss, alpha=alpha))
    loss = jax.block_until_ready(loss_fn(predictions, target, seg))

    ref = _reference(predictions, target, seg, alpha)
    assert jnp.allclose(loss, ref, rtol=1e-5, atol=1e-6), (loss, ref)

    print("KERNEL_OK")
</pallas_src>

<mosaic_0001>
module attributes {stable_mosaic.version = 11 : i64} {
  func.func @_tumorseg_sums_kernel(%arg0: i32, %arg1: memref<16x128xf32, #tpu.memory_space<vmem>>, %arg2: memref<16x128xf32, #tpu.memory_space<vmem>>, %arg3: memref<16x128xf32, #tpu.memory_space<vmem>>, %arg4: memref<2x8x128xf32, #tpu.memory_space<vmem>>) attributes {dimension_semantics = [#tpu.dimension_semantics<arbitrary>], iteration_bounds = array<i64: 1>, scalar_prefetch = 0 : i64, scratch_operands = 0 : i64, tpu.core_type = #tpu.core_type<tc>, window_params = [{transform_indices = @transform_0, window_bounds = array<i64: 16, 128>}, {transform_indices = @transform_1, window_bounds = array<i64: 16, 128>}, {transform_indices = @transform_2, window_bounds = array<i64: 16, 128>}, {pipeline_mode = #tpu.pipeline_mode<synchronous>, transform_indices = @transform_3, window_bounds = array<i64: 2, 8, 128>}]} {
    %c0_i32 = arith.constant 0 : i32
    %0 = arith.cmpi eq, %arg0, %c0_i32 : i32
    %1 = arith.extui %0 : i1 to i32
    %c0_i32_0 = arith.constant 0 : i32
    %2 = arith.cmpi ne, %1, %c0_i32_0 : i32
    scf.if %2 {
      %cst_23 = arith.constant 0.000000e+00 : f32
      %52 = vector.broadcast %cst_23 : f32 to vector<2x8x128xf32>
      %c0_24 = arith.constant 0 : index
      %c0_25 = arith.constant 0 : index
      %c0_26 = arith.constant 0 : index
      %53 = vector.load %arg4[%c0_24, %c0_25, %c0_26] : memref<2x8x128xf32, #tpu.memory_space<vmem>>, vector<2x8x128xf32>
      tpu.vector_store %arg4[%c0_24, %c0_25, %c0_26], %52 {strides = array<i32>} : memref<2x8x128xf32, #tpu.memory_space<vmem>>, vector<2x8x128xf32>,
    } else {
    }
    %cst = arith.constant 0.000000e+00 : f32
    %3 = vector.broadcast %cst : f32 to vector<8x128xf32>
    %c0_i32_1 = arith.constant 0 : i32
    %c8_i32 = arith.constant 8 : i32
    %4 = arith.muli %c0_i32_1, %c8_i32 : i32
    %5 = tpu.assume_multiple %4, 8 : i32
    %6 = arith.index_cast %5 : i32 to index
    %c0 = arith.constant 0 : index
    %7 = vector.load %arg1[%6, %c0] : memref<16x128xf32, #tpu.memory_space<vmem>>, vector<8x128xf32>
    %8 = arith.index_cast %5 : i32 to index
    %c0_2 = arith.constant 0 : index
    %9 = vector.load %arg2[%8, %c0_2] : memref<16x128xf32, #tpu.memory_space<vmem>>, vector<8x128xf32>
    %10 = arith.index_cast %5 : i32 to index
    %c0_3 = arith.constant 0 : index
    %11 = vector.load %arg3[%10, %c0_3] : memref<16x128xf32, #tpu.memory_space<vmem>>, vector<8x128xf32>
    %12 = arith.subf %7, %9 : vector<8x128xf32>
    %13 = math.absf %12 : vector<8x128xf32>
    %14 = math.absf %11 : vector<8x128xf32>
    %15 = arith.mulf %13, %14 : vector<8x128xf32>
    %16 = vector.shape_cast %13 : vector<8x128xf32> to vector<1x8x128xf32>
    %cst_4 = arith.constant dense<0.000000e+00> : vector<8x128xf32>
    %17 = vector.multi_reduction <add>, %16, %cst_4 [0] : vector<1x8x128xf32> to vector<8x128xf32>
    %18 = arith.addf %3, %17 : vector<8x128xf32>
    %19 = vector.shape_cast %15 : vector<8x128xf32> to vector<1x8x128xf32>
    %cst_5 = arith.constant dense<0.000000e+00> : vector<8x128xf32>
    %20 = vector.multi_reduction <add>, %19, %cst_5 [0] : vector<1x8x128xf32> to vector<8x128xf32>
    %21 = arith.addf %3, %20 : vector<8x128xf32>
    %c1_i32 = arith.constant 1 : i32
    %c8_i32_6 = arith.constant 8 : i32
    %22 = arith.muli %c1_i32, %c8_i32_6 : i32
    %23 = tpu.assume_multiple %22, 8 : i32
    %24 = arith.index_cast %23 : i32 to index
    %c0_7 = arith.constant 0 : index
    %25 = vector.load %arg1[%24, %c0_7] : memref<16x128xf32, #tpu.memory_space<vmem>>, vector<8x128xf32>
    %26 = arith.index_cast %23 : i32 to index
    %c0_8 = arith.constant 0 : index
    %27 = vector.load %arg2[%26, %c0_8] : memref<16x128xf32, #tpu.memory_space<vmem>>, vector<8x128xf32>
    %28 = arith.index_cast %23 : i32 to index
    %c0_9 = arith.constant 0 : index
    %29 = vector.load %arg3[%28, %c0_9] : memref<16x128xf32, #tpu.memory_space<vmem>>, vector<8x128xf32>
    %30 = arith.subf %25, %27 : vector<8x128xf32>
    %31 = math.absf %30 : vector<8x128xf32>
    %32 = math.absf %29 : vector<8x128xf32>
    %33 = arith.mulf %31, %32 : vector<8x128xf32>
    %34 = vector.shape_cast %31 : vector<8x128xf32> to vector<1x8x128xf32>
    %cst_10 = arith.constant dense<0.000000e+00> : vector<8x128xf32>
    %35 = vector.multi_reduction <add>, %34, %cst_10 [0] : vector<1x8x128xf32> to vector<8x128xf32>
    %36 = arith.addf %18, %35 : vector<8x128xf32>
    %37 = vector.shape_cast %33 : vector<8x128xf32> to vector<1x8x128xf32>
    %cst_11 = arith.constant dense<0.000000e+00> : vector<8x128xf32>
    %38 = vector.multi_reduction <add>, %37, %cst_11 [0] : vector<1x8x128xf32> to vector<8x128xf32>
    %39 = arith.addf %21, %38 : vector<8x128xf32>
    %c2_i32 = arith.constant 2 : i32
    %c0_12 = arith.constant 0 : index
    %c0_13 = arith.constant 0 : index
    %c0_14 = arith.constant 0 : index
    %40 = vector.load %arg4[%c0_12, %c0_13, %c0_14] : memref<2x8x128xf32, #tpu.memory_space<vmem>>, vector<1x8x128xf32>
    %41 = vector.shape_cast %40 : vector<1x8x128xf32> to vector<8x128xf32>
    %42 = arith.addf %41, %36 : vector<8x128xf32>
    %c0_15 = arith.constant 0 : index
    %c0_16 = arith.constant 0 : index
    %c0_17 = arith.constant 0 : index
    %43 = vector.load %arg4[%c0_15, %c0_16, %c0_17] : memref<2x8x128xf32, #tpu.memory_space<vmem>>, vector<1x8x128xf32>
    %44 = vector.shape_cast %43 : vector<1x8x128xf32> to vector<8x128xf32>
    %45 = vector.shape_cast %42 : vector<8x128xf32> to vector<1x8x128xf32>
    tpu.vector_store %arg4[%c0_15, %c0_16, %c0_17], %45 {strides = array<i32>} : memref<2x8x128xf32, #tpu.memory_space<vmem>>, vector<1x8x128xf32>,
    %c1 = arith.constant 1 : index
    %c0_18 = arith.constant 0 : index
    %c0_19 = arith.constant 0 : index
    %46 = vector.load %arg4[%c1, %c0_18, %c0_19] : memref<2x8x128xf32, #tpu.memory_space<vmem>>, vector<1x8x128xf32>
    %47 = vector.shape_cast %46 : vector<1x8x128xf32> to vector<8x128xf32>
    %48 = arith.addf %47, %39 : vector<8x128xf32>
    %c1_20 = arith.constant 1 : index
    %c0_21 = arith.constant 0 : index
    %c0_22 = arith.constant 0 : index
    %49 = vector.load %arg4[%c1_20, %c0_21, %c0_22] : memref<2x8x128xf32, #tpu.memory_space<vmem>>, vector<1x8x128xf32>
    %50 = vector.shape_cast %49 : vector<1x8x128xf32> to vector<8x128xf32>
    %51 = vector.shape_cast %48 : vector<8x128xf32> to vector<1x8x128xf32>
    tpu.vector_store %arg4[%c1_20, %c0_21, %c0_22], %51 {strides = array<i32>} : memref<2x8x128xf32, #tpu.memory_space<vmem>>, vector<1x8x128xf32>,
    return
  }
  func.func @transform_0(%arg0: i32) -> (i32, i32) {
    %c0_i32 = arith.constant 0 : i32
    %c0_i32_0 = arith.constant 0 : i32
    return %arg0, %c0_i32 : i32, i32
  }
  func.func @transform_1(%arg0: i32) -> (i32, i32) {
    %c0_i32 = arith.constant 0 : i32
    %c0_i32_0 = arith.constant 0 : i32
    return %arg0, %c0_i32 : i32, i32
  }
  func.func @transform_2(%arg0: i32) -> (i32, i32) {
    %c0_i32 = arith.constant 0 : i32
    %c0_i32_0 = arith.constant 0 : i32
    return %arg0, %c0_i32 : i32, i32
  }
  func.func @transform_3(%arg0: i32) -> (i32, i32, i32) {
    %c0_i32 = arith.constant 0 : i32
    %c0_i32_0 = arith.constant 0 : i32
    %c0_i32_1 = arith.constant 0 : i32
    %c0_i32_2 = arith.constant 0 : i32
    return %c0_i32, %c0_i32_0, %c0_i32_1 : i32, i32, i32
  }
}

</mosaic_0001>

<bundles_post_ra>
// kernel: tumorseg_loss.1
= control target key start
LH: loop header
LB: loop body
LE: loop exit
PB: predicated region body
PF: predicated region fallthrough
CT: control target
= control target key end

     0   :  { %s106_s0 = inlined_call_operand.vmem [shape: f32[16,128], index: 0, kind: input, shape index: {}]   ;;  %s107_s1 = inlined_call_operand.vmem [shape: f32[16,128], index: 1, kind: input, shape index: {}]   ;;  %s108_s2 = inlined_call_operand.vmem [shape: f32[16,128], index: 2, kind: input, shape index: {}]   ;;  %s109_s3 = inlined_call_operand.vmem [shape: f32[2,8,128], index: 3, kind: output, shape index: {}]  }
   0x1   :  { %v20_v0 = vld [vmem:[%s106_s0] sm:$0xff]  ;;  %v56_v2 = vld [vmem:[%s106_s0 + $0x8] sm:$0xff] }
   0x2   :  { %v21_v1 = vld [vmem:[%s107_s1] sm:$0xff]  ;;  %v57_v4 = vld [vmem:[%s107_s1 + $0x8] sm:$0xff] }
   0x3   :  { %v23_v3 = vsub.f32 %v20_v0, %v21_v1  ;;  %v22_v5 = vld [vmem:[%s108_s2] sm:$0xff]  ;;  %v58_v6 = vld [vmem:[%s108_s2 + $0x8] sm:$0xff]  ;;  %v37_v7 = vsub.f32 %v56_v2, %v57_v4 }
   0x4   :  { %v25_v8 = vand.u32 2147483647, %v22_v5  ;;  %v39_v9 = vand.u32 2147483647, %v58_v6 }
   0x5   :  { %v24_v10 = vand.u32 2147483647, %v23_v3  ;;  %v38_v11 = vand.u32 2147483647, %v37_v7 }
   0x7   :  { %v26_v12 = vmul.f32 %v25_v8, %v24_v10  ;;  %v42_v13 = vadd.f32 %v38_v11, %v24_v10  ;;  %v40_v14 = vmul.f32 %v39_v9, %v38_v11 }
   0x9   :  { %v44_v15 = vadd.f32 %v40_v14, %v26_v12  ;;  %47 = vst [vmem:[%s109_s3] sm:$0xff] %v42_v13 }
   0xb   :  { %60 = vst [vmem:[%s109_s3 + $0x8] sm:$0xff] %v44_v15 }

</bundles_post_ra>
